<compile_context>
chip_gen: v7x
topology: tpu7x:2x2x1
jax: 0.10.0
libtpu: 0.0.40
codegen_flags: <defaults>
</compile_context>

<pallas_src>
import functools

import jax
import jax.numpy as jnp
from jax import lax
from jax.experimental import pallas as pl
from jax.experimental.pallas import tpu as pltpu


def _cdiv(a, b):
    return -(-a // b)


def _vmem_limit_bytes():
    """Generation-aware scoped-VMEM limit (~3/4 of physical VMEM)."""
    cap = 64 * 1024 * 1024                       # conservative floor (v7x)
    try:
        info = pltpu.get_tpu_info()
        cap = int(getattr(info, "vmem_capacity_bytes", cap) or cap)
    except Exception:
        pass
    return max(16 << 20, min((cap * 3) // 4, 112 << 20))


def _pick_pack(n, d):
    """Lane-packing factor: view (N, D) as (N/pack, D*pack) so the minor dim is
    as close to 128 lanes as possible.  Only used when the reshape is a free
    row-major view (pack divides N)."""
    if 0 < d < 128 and 128 % d == 0:
        p = 128 // d                              # always a power of two
        while p > 1 and n % p != 0:
            p //= 2
        return p
    return 1


def _ns_solve(s_raw, gram_raw, *, n, d, eps, iterations):
    """From the raw per-feature sum (1, D) and raw Gram X^T X (D, D), compute the
    Newton-Schulz whitening matrix wm (D, D) and mproj = mean @ wm.T (1, D)."""
    n_f = float(n)
    m = s_raw * (1.0 / n_f)                                        # (1, D)
    mmt = lax.dot_general(m, m, (((0,), (0,)), ((), ())),
                          preferred_element_type=jnp.float32)      # m^T m  (D, D)
    gram_c = gram_raw - n_f * mmt                                  # xn^T xn
    ri = lax.broadcasted_iota(jnp.int32, (d, d), 0)
    ci = lax.broadcasted_iota(jnp.int32, (d, d), 1)
    diag = ri == ci
    eye = jnp.where(diag, 1.0, 0.0).astype(jnp.float32)
    if eps == 0.0:
        # sigma == cov: fold 1/(N-1) and 1/trace into a single scale.
        tr_raw = jnp.sum(jnp.where(diag, gram_c, 0.0))
        sigma_n = gram_c * (1.0 / tr_raw)
        trace_sigma = tr_raw * (1.0 / (n_f - 1.0))
    else:
        cov = gram_c * (1.0 / (n_f - 1.0))
        sigma = (1.0 - eps) * cov + eps * eye
        trace_sigma = jnp.sum(jnp.where(diag, sigma, 0.0))
        sigma_n = sigma * (1.0 / trace_sigma)
    # Newton-Schulz; first iteration peeled analytically (P = I).
    p = 1.5 * eye - 0.5 * sigma_n if iterations >= 1 else eye
    for _ in range(max(iterations - 1, 0)):
        p2 = jnp.dot(p, p, preferred_element_type=jnp.float32)
        p3 = jnp.dot(p2, p, preferred_element_type=jnp.float32)
        p = 1.5 * p - 0.5 * jnp.dot(p3, sigma_n,
                                    preferred_element_type=jnp.float32)
    wm = p * lax.rsqrt(trace_sigma)
    # mproj = m @ wm.T (contract dim 1 of both operands; no transpose built).
    mproj = lax.dot_general(m, wm, (((1,), (1,)), ((), ())),
                            preferred_element_type=jnp.float32)
    return wm, mproj


def make_fused_kernel(n, d, eps, iterations):
    """Whole problem fits VMEM: stats + solve + whiten in a single pallas_call."""
    def kernel(x_ref, out_ref):
        x = x_ref[...]                                             # (N, D) native dtype
        s = jnp.sum(x.astype(jnp.float32), axis=0, keepdims=True)  # (1, D)
        gram = lax.dot_general(x, x, (((0,), (0,)), ((), ())),
                               preferred_element_type=jnp.float32)  # (D, D)
        wm, mproj = _ns_solve(s, gram, n=n, d=d, eps=eps, iterations=iterations)
        # (x - m) @ wm.T == x @ wm.T - m @ wm.T ; x feeds the MXU in native dtype.
        y = lax.dot_general(x, wm, (((1,), (1,)), ((), ())),
                            preferred_element_type=jnp.float32) - mproj
        out_ref[...] = y.astype(out_ref.dtype)
    return kernel


def make_stats_kernel(r_valid, tile_r, tiles_per_chunk):
    """Streaming stats over the packed (R, Dp) view: packed row-sum and packed
    Gram accumulated directly into the per-chunk output blocks (no scratch);
    the ragged / overrun tiles are row-masked with an iota compare+select."""
    def kernel(x_ref, psum_ref, pgram_ref):
        c = pl.program_id(0)
        t = pl.program_id(1)

        @pl.when(t == 0)
        def _init():
            psum_ref[...] = jnp.zeros_like(psum_ref)
            pgram_ref[...] = jnp.zeros_like(pgram_ref)

        x = x_ref[...]                                             # (tile_r, Dp)
        base = (c * tiles_per_chunk + t) * tile_r
        row = base + lax.broadcasted_iota(jnp.int32, (tile_r, 1), 0)
        xm = jnp.where(row < r_valid, x, jnp.zeros_like(x))        # mask OOB rows
        psum_ref[...] += jnp.sum(xm.astype(jnp.float32), axis=0, keepdims=True)
        # Packed X^T X: batch axis contracted directly (no .T relayout of the
        # activation); native-dtype operands go to the MXU with f32 accumulate.
        pgram_ref[...] += lax.dot_general(xm, xm, (((0,), (0,)), ((), ())),
                                          preferred_element_type=jnp.float32)
    return kernel


def make_solve_kernel(n, d, eps, iterations):
    def kernel(s_ref, g_ref, wm_ref, mproj_ref):
        wm, mproj = _ns_solve(s_ref[...], g_ref[...], n=n, d=d,
                              eps=eps, iterations=iterations)
        wm_ref[...] = wm
        mproj_ref[...] = mproj
    return kernel


def whiten_kernel(x_ref, w_ref, mproj_ref, out_ref):
    # out = x @ W^T - mproj with W = blockdiag(wm): per D-lane segment this is
    # (x_seg - m) @ wm.T.  Lane-dense loads/stores; x in native dtype to MXU.
    y = lax.dot_general(x_ref[...], w_ref[...], (((1,), (1,)), ((), ())),
                        preferred_element_type=jnp.float32)
    out_ref[...] = (y - mproj_ref[...]).astype(out_ref.dtype)


@functools.partial(jax.jit,
                   static_argnames=("eps", "iterations", "tile_bytes", "fused_bytes"))
def whitening2d_iternorm(x, *, eps=0.0, iterations=5, tile_bytes=None,
                         fused_bytes=None):
    """x: (N, D) float array. Training-mode forward of Whitening2dIterNorm (dim=0)."""
    N, D = x.shape
    itemsize = jnp.dtype(x.dtype).itemsize
    vmem_limit = _vmem_limit_bytes()
    if tile_bytes is None:                       # multi-MiB streaming tiles
        tile_bytes = min(16 << 20, max(1 << 20, vmem_limit // 8))
    if fused_bytes is None:                      # single-kernel threshold
        fused_bytes = min(8 << 20, vmem_limit // 8)

    # ---- small problems: one fused pallas_call (stats + solve + whiten) ----
    if N * D * itemsize <= fused_bytes:
        return pl.pallas_call(
            make_fused_kernel(N, D, eps, iterations),
            out_shape=jax.ShapeDtypeStruct((N, D), x.dtype),
            grid_spec=pltpu.PrefetchScalarGridSpec(
                num_scalar_prefetch=0,
                grid=(1,),
                in_specs=[pl.BlockSpec((N, D), lambda i: (0, 0))],
                out_specs=pl.BlockSpec((N, D), lambda i: (0, 0))),
            compiler_params=pltpu.CompilerParams(
                dimension_semantics=("arbitrary",),
                vmem_limit_bytes=vmem_limit),
        )(x)

    # ---- streaming path ----
    # Lane-dense packed view: (N, D) -> (R, Dp) with Dp as close to 128 as
    # possible.  Row-major reshape => no HBM copy.
    pack = _pick_pack(N, D)
    R, Dp = N // pack, D * pack
    x2 = x.reshape(R, Dp)

    rows = max(8, (tile_bytes // (Dp * itemsize)) // 8 * 8)
    tile_r = R if rows >= R else rows
    num_tiles = _cdiv(R, tile_r)
    # Leading "parallel" chunk axis shards the stats pass across v7x's two
    # TensorCores; on single-core chips it is just a serial loop.
    num_chunks = 2 if num_tiles >= 2 else 1
    tpc = _cdiv(num_tiles, num_chunks)

    # Phase 1: streaming row-sum + packed Gram, accumulated into per-chunk outputs.
    psum, pgram = pl.pallas_call(
        make_stats_kernel(R, tile_r, tpc),
        out_shape=(jax.ShapeDtypeStruct((num_chunks, 1, Dp), jnp.float32),
                   jax.ShapeDtypeStruct((num_chunks, Dp, Dp), jnp.float32)),
        grid_spec=pltpu.PrefetchScalarGridSpec(
            num_scalar_prefetch=0,
            grid=(num_chunks, tpc),
            in_specs=[pl.BlockSpec(
                (tile_r, Dp),
                lambda c, t: (jnp.minimum(c * tpc + t, num_tiles - 1), 0))],
            out_specs=[pl.BlockSpec((None, 1, Dp), lambda c, t: (c, 0, 0)),
                       pl.BlockSpec((None, Dp, Dp), lambda c, t: (c, 0, 0))]),
        compiler_params=pltpu.CompilerParams(
            dimension_semantics=("parallel", "arbitrary"),
            vmem_limit_bytes=vmem_limit),
    )(x2)

    # Tiny O(Dp^2) glue in the wrapper: combine chunk partials and fold the
    # packed Gram / sum (sum of the `pack` diagonal DxD blocks / lane segments).
    s_big = jnp.sum(psum, axis=0)                                  # (1, Dp)
    g_big = jnp.sum(pgram, axis=0)                                 # (Dp, Dp)
    if pack > 1:
        s_raw = jnp.sum(s_big.reshape(pack, D), axis=0, keepdims=True)
        g_raw = g_big[0:D, 0:D]
        for p in range(1, pack):
            g_raw = g_raw + g_big[p * D:(p + 1) * D, p * D:(p + 1) * D]
    else:
        s_raw, g_raw = s_big, g_big

    # Phase 2: Newton-Schulz solve (single tiny grid step).
    wm, mproj_small = pl.pallas_call(
        make_solve_kernel(N, D, eps, iterations),
        out_shape=(jax.ShapeDtypeStruct((D, D), jnp.float32),
                   jax.ShapeDtypeStruct((1, D), jnp.float32)),
        grid_spec=pltpu.PrefetchScalarGridSpec(
            num_scalar_prefetch=0,
            grid=(1,),
            in_specs=[pl.BlockSpec((1, D), lambda i: (0, 0)),
                      pl.BlockSpec((D, D), lambda i: (0, 0))],
            out_specs=[pl.BlockSpec((D, D), lambda i: (0, 0)),
                       pl.BlockSpec((1, D), lambda i: (0, 0))]),
        compiler_params=pltpu.CompilerParams(
            dimension_semantics=("arbitrary",),
            vmem_limit_bytes=vmem_limit),
    )(s_raw, g_raw)

    # Block-diagonal operand so phase 3 runs on the lane-dense packed view.
    # Built once in the wrapper (pure layout plumbing, 64 KB at Dp=128).
    if pack > 1:
        w_big = jnp.kron(jnp.eye(pack, dtype=jnp.float32), wm)     # (Dp, Dp)
        mproj = jnp.tile(mproj_small, (1, pack))                   # (1, Dp)
    else:
        w_big, mproj = wm, mproj_small

    # Phase 3: tiled, lane-dense whitening matmul, "parallel" over row tiles.
    # OOB rows of the last (ragged) block are computed then dropped on write.
    # (W / mproj have constant block index; their default double-buffer is only
    #  ~2*Dp^2*4 B here, so pipeline_mode is left at the default.)
    out2 = pl.pallas_call(
        whiten_kernel,
        out_shape=jax.ShapeDtypeStruct((R, Dp), x.dtype),
        grid_spec=pltpu.PrefetchScalarGridSpec(
            num_scalar_prefetch=0,
            grid=(num_tiles,),
            in_specs=[pl.BlockSpec((tile_r, Dp), lambda i: (i, 0)),
                      pl.BlockSpec((Dp, Dp), lambda i: (0, 0)),
                      pl.BlockSpec((1, Dp), lambda i: (0, 0))],
            out_specs=pl.BlockSpec((tile_r, Dp), lambda i: (i, 0))),
        compiler_params=pltpu.CompilerParams(
            dimension_semantics=("parallel",),
            vmem_limit_bytes=vmem_limit),
    )(x2, w_big, mproj)
    return out2.reshape(N, D)


def _reference(x, eps=0.0, iterations=5):
    """Pure-JAX reference mirroring the PyTorch module (dim=0, training)."""
    x = x.astype(jnp.float32)
    n, d = x.shape
    m = jnp.mean(x, axis=0, keepdims=True)
    xn = x - m
    f_cov = (xn.T @ xn) / (n - 1)
    eye = jnp.eye(d, dtype=jnp.float32)
    sigma = (1.0 - eps) * f_cov + eps * eye
    trace = jnp.trace(sigma)
    sigma_n = sigma / trace
    p = eye
    for _ in range(iterations):
        p = 1.5 * p - 0.5 * (p @ p @ p @ sigma_n)
    wm = p / jnp.sqrt(trace)
    return xn @ wm.T


if __name__ == "__main__":
    # Module params: num_features=32, momentum=0.01, track_running_stats=True,
    # eps=0, iterations=5, dim=0.  Buffers (running_mean zeros, running_variance
    # eye) are deterministic and unused on the training-mode forward path.
    key = jax.random.PRNGKey(0)
    k1, k2, k3, k4 = jax.random.split(key, 4)
    D = 32

    def _check(x, label, **kw):
        out = jax.block_until_ready(
            whitening2d_iternorm(x, eps=0.0, iterations=5, **kw))
        ref = _reference(x, eps=0.0, iterations=5)
        assert out.shape == x.shape, f"bad shape ({label})"
        assert jnp.allclose(out, ref, atol=2e-3, rtol=2e-3), \
            f"mismatch vs reference ({label})"

    # Canonical small case -> single fused kernel.
    _check(jax.random.normal(k1, (8, D), jnp.float32), "fused-small")
    # Larger batch, still the fused single-call path (fits the VMEM budget).
    _check(jax.random.normal(k2, (4096, D), jnp.float32), "fused-4096")
    # Force the streaming 3-kernel path: pack=4 lane-dense view, ragged last
    # tile and odd tile count (exercises 2-chunk grid, index clamp, masking).
    _check(jax.random.normal(k3, (2064, D), jnp.float32), "stream-packed",
           tile_bytes=64 * 1024, fused_bytes=0)
    # Streaming path with N % 4 != 0 -> pack=2 view.
    _check(jax.random.normal(k4, (1030, D), jnp.float32), "stream-pack2",
           tile_bytes=64 * 1024, fused_bytes=0)

    print("KERNEL_OK")
</pallas_src>

<mosaic_0001>
module attributes {stable_mosaic.version = 11 : i64} {
  func.func @kernel(%arg0: i32, %arg1: memref<8x32xf32, #tpu.memory_space<vmem>>, %arg2: memref<8x32xf32, #tpu.memory_space<vmem>>) attributes {dimension_semantics = [#tpu.dimension_semantics<arbitrary>], iteration_bounds = array<i64: 1>, scalar_prefetch = 0 : i64, scratch_operands = 0 : i64, tpu.core_type = #tpu.core_type<tc>, window_params = [{pipeline_mode = #tpu.pipeline_mode<synchronous>, transform_indices = @transform_0, window_bounds = array<i64: 8, 32>}, {pipeline_mode = #tpu.pipeline_mode<synchronous>, transform_indices = @transform_1, window_bounds = array<i64: 8, 32>}]} {
    %c0 = arith.constant 0 : index
    %c0_0 = arith.constant 0 : index
    %0 = vector.load %arg1[%c0, %c0_0] : memref<8x32xf32, #tpu.memory_space<vmem>>, vector<8x32xf32>
    %cst = arith.constant dense<0.000000e+00> : vector<32xf32>
    %1 = vector.multi_reduction <add>, %0, %cst [0] : vector<8x32xf32> to vector<32xf32>
    %2 = vector.shape_cast %1 : vector<32xf32> to vector<1x32xf32>
    %cst_1 = arith.constant dense<0.000000e+00> : vector<32x32xf32>
    %3 = tpu.matmul %0, %0, %cst_1 {dimension_numbers = #tpu.dot_dimension_numbers<[0], [0], [1], [1], [0, 1, 1, 1], [], []>} : vector<8x32xf32>, vector<8x32xf32>, vector<32x32xf32> -> vector<32x32xf32>
    %cst_2 = arith.constant 1.250000e-01 : f32
    %4 = vector.broadcast %cst_2 : f32 to vector<1x32xf32>
    %5 = arith.mulf %2, %4 : vector<1x32xf32>
    %cst_3 = arith.constant dense<0.000000e+00> : vector<32x32xf32>
    %6 = tpu.matmul %5, %5, %cst_3 {dimension_numbers = #tpu.dot_dimension_numbers<[0], [0], [1], [1], [0, 1, 1, 1], [], []>} : vector<1x32xf32>, vector<1x32xf32>, vector<32x32xf32> -> vector<32x32xf32>
    %cst_4 = arith.constant 8.000000e+00 : f32
    %7 = vector.broadcast %cst_4 : f32 to vector<32x32xf32>
    %8 = arith.mulf %7, %6 : vector<32x32xf32>
    %9 = arith.subf %3, %8 : vector<32x32xf32>
    %10 = tpu.iota {dimensions = array<i32: 0>} : vector<32x32xi32>
    %11 = tpu.iota {dimensions = array<i32: 1>} : vector<32x32xi32>
    %12 = arith.cmpi eq, %10, %11 : vector<32x32xi32>
    %cst_5 = arith.constant 1.000000e+00 : f32
    %cst_6 = arith.constant 0.000000e+00 : f32
    %13 = vector.broadcast %cst_5 : f32 to vector<32x32xf32>
    %14 = vector.broadcast %cst_6 : f32 to vector<32x32xf32>
    %15 = arith.select %12, %13, %14 : vector<32x32xi1>, vector<32x32xf32>
    %cst_7 = arith.constant 0.000000e+00 : f32
    %16 = vector.broadcast %cst_7 : f32 to vector<32x32xf32>
    %17 = arith.select %12, %9, %16 : vector<32x32xi1>, vector<32x32xf32>
    %18 = vector.shape_cast %17 : vector<32x32xf32> to vector<1x32x32xf32>
    %cst_8 = arith.constant dense<0.000000e+00> : vector<1xf32>
    %19 = vector.multi_reduction <add>, %18, %cst_8 [1, 2] : vector<1x32x32xf32> to vector<1xf32>
    %20 = vector.shape_cast %19 : vector<1xf32> to vector<1x1x1xf32>
    %21 = vector.extract %20[0, 0, 0] : f32 from vector<1x1x1xf32>
    %cst_9 = arith.constant 1.000000e+00 : f32
    %22 = arith.divf %cst_9, %21 : f32
    %23 = vector.broadcast %22 : f32 to vector<32x32xf32>
    %24 = arith.mulf %9, %23 : vector<32x32xf32>
    %cst_10 = arith.constant 0.142857149 : f32
    %25 = arith.mulf %21, %cst_10 : f32
    %cst_11 = arith.constant 1.500000e+00 : f32
    %26 = vector.broadcast %cst_11 : f32 to vector<32x32xf32>
    %27 = arith.mulf %26, %15 : vector<32x32xf32>
    %cst_12 = arith.constant 5.000000e-01 : f32
    %28 = vector.broadcast %cst_12 : f32 to vector<32x32xf32>
    %29 = arith.mulf %28, %24 : vector<32x32xf32>
    %30 = arith.subf %27, %29 : vector<32x32xf32>
    %cst_13 = arith.constant dense<0.000000e+00> : vector<32x32xf32>
    %31 = tpu.matmul %30, %30, %cst_13 {dimension_numbers = #tpu.dot_dimension_numbers<[1], [0], [0], [1], [0, 0, 1, 1], [], []>} : vector<32x32xf32>, vector<32x32xf32>, vector<32x32xf32> -> vector<32x32xf32>
    %cst_14 = arith.constant dense<0.000000e+00> : vector<32x32xf32>
    %32 = tpu.matmul %31, %30, %cst_14 {dimension_numbers = #tpu.dot_dimension_numbers<[1], [0], [0], [1], [0, 0, 1, 1], [], []>} : vector<32x32xf32>, vector<32x32xf32>, vector<32x32xf32> -> vector<32x32xf32>
    %cst_15 = arith.constant 1.500000e+00 : f32
    %33 = vector.broadcast %cst_15 : f32 to vector<32x32xf32>
    %34 = arith.mulf %33, %30 : vector<32x32xf32>
    %cst_16 = arith.constant dense<0.000000e+00> : vector<32x32xf32>
    %35 = tpu.matmul %32, %24, %cst_16 {dimension_numbers = #tpu.dot_dimension_numbers<[1], [0], [0], [1], [0, 0, 1, 1], [], []>} : vector<32x32xf32>, vector<32x32xf32>, vector<32x32xf32> -> vector<32x32xf32>
    %cst_17 = arith.constant 5.000000e-01 : f32
    %36 = vector.broadcast %cst_17 : f32 to vector<32x32xf32>
    %37 = arith.mulf %36, %35 : vector<32x32xf32>
    %38 = arith.subf %34, %37 : vector<32x32xf32>
    %cst_18 = arith.constant dense<0.000000e+00> : vector<32x32xf32>
    %39 = tpu.matmul %38, %38, %cst_18 {dimension_numbers = #tpu.dot_dimension_numbers<[1], [0], [0], [1], [0, 0, 1, 1], [], []>} : vector<32x32xf32>, vector<32x32xf32>, vector<32x32xf32> -> vector<32x32xf32>
    %cst_19 = arith.constant dense<0.000000e+00> : vector<32x32xf32>
    %40 = tpu.matmul %39, %38, %cst_19 {dimension_numbers = #tpu.dot_dimension_numbers<[1], [0], [0], [1], [0, 0, 1, 1], [], []>} : vector<32x32xf32>, vector<32x32xf32>, vector<32x32xf32> -> vector<32x32xf32>
    %cst_20 = arith.constant 1.500000e+00 : f32
    %41 = vector.broadcast %cst_20 : f32 to vector<32x32xf32>
    %42 = arith.mulf %41, %38 : vector<32x32xf32>
    %cst_21 = arith.constant dense<0.000000e+00> : vector<32x32xf32>
    %43 = tpu.matmul %40, %24, %cst_21 {dimension_numbers = #tpu.dot_dimension_numbers<[1], [0], [0], [1], [0, 0, 1, 1], [], []>} : vector<32x32xf32>, vector<32x32xf32>, vector<32x32xf32> -> vector<32x32xf32>
    %cst_22 = arith.constant 5.000000e-01 : f32
    %44 = vector.broadcast %cst_22 : f32 to vector<32x32xf32>
    %45 = arith.mulf %44, %43 : vector<32x32xf32>
    %46 = arith.subf %42, %45 : vector<32x32xf32>
    %cst_23 = arith.constant dense<0.000000e+00> : vector<32x32xf32>
    %47 = tpu.matmul %46, %46, %cst_23 {dimension_numbers = #tpu.dot_dimension_numbers<[1], [0], [0], [1], [0, 0, 1, 1], [], []>} : vector<32x32xf32>, vector<32x32xf32>, vector<32x32xf32> -> vector<32x32xf32>
    %cst_24 = arith.constant dense<0.000000e+00> : vector<32x32xf32>
    %48 = tpu.matmul %47, %46, %cst_24 {dimension_numbers = #tpu.dot_dimension_numbers<[1], [0], [0], [1], [0, 0, 1, 1], [], []>} : vector<32x32xf32>, vector<32x32xf32>, vector<32x32xf32> -> vector<32x32xf32>
    %cst_25 = arith.constant 1.500000e+00 : f32
    %49 = vector.broadcast %cst_25 : f32 to vector<32x32xf32>
    %50 = arith.mulf %49, %46 : vector<32x32xf32>
    %cst_26 = arith.constant dense<0.000000e+00> : vector<32x32xf32>
    %51 = tpu.matmul %48, %24, %cst_26 {dimension_numbers = #tpu.dot_dimension_numbers<[1], [0], [0], [1], [0, 0, 1, 1], [], []>} : vector<32x32xf32>, vector<32x32xf32>, vector<32x32xf32> -> vector<32x32xf32>
    %cst_27 = arith.constant 5.000000e-01 : f32
    %52 = vector.broadcast %cst_27 : f32 to vector<32x32xf32>
    %53 = arith.mulf %52, %51 : vector<32x32xf32>
    %54 = arith.subf %50, %53 : vector<32x32xf32>
    %cst_28 = arith.constant dense<0.000000e+00> : vector<32x32xf32>
    %55 = tpu.matmul %54, %54, %cst_28 {dimension_numbers = #tpu.dot_dimension_numbers<[1], [0], [0], [1], [0, 0, 1, 1], [], []>} : vector<32x32xf32>, vector<32x32xf32>, vector<32x32xf32> -> vector<32x32xf32>
    %cst_29 = arith.constant dense<0.000000e+00> : vector<32x32xf32>
    %56 = tpu.matmul %55, %54, %cst_29 {dimension_numbers = #tpu.dot_dimension_numbers<[1], [0], [0], [1], [0, 0, 1, 1], [], []>} : vector<32x32xf32>, vector<32x32xf32>, vector<32x32xf32> -> vector<32x32xf32>
    %cst_30 = arith.constant 1.500000e+00 : f32
    %57 = vector.broadcast %cst_30 : f32 to vector<32x32xf32>
    %58 = arith.mulf %57, %54 : vector<32x32xf32>
    %cst_31 = arith.constant dense<0.000000e+00> : vector<32x32xf32>
    %59 = tpu.matmul %56, %24, %cst_31 {dimension_numbers = #tpu.dot_dimension_numbers<[1], [0], [0], [1], [0, 0, 1, 1], [], []>} : vector<32x32xf32>, vector<32x32xf32>, vector<32x32xf32> -> vector<32x32xf32>
    %cst_32 = arith.constant 5.000000e-01 : f32
    %60 = vector.broadcast %cst_32 : f32 to vector<32x32xf32>
    %61 = arith.mulf %60, %59 : vector<32x32xf32>
    %62 = arith.subf %58, %61 : vector<32x32xf32>
    %63 = math.rsqrt %25 : f32
    %64 = vector.broadcast %63 : f32 to vector<32x32xf32>
    %65 = arith.mulf %62, %64 : vector<32x32xf32>
    %cst_33 = arith.constant dense<0.000000e+00> : vector<1x32xf32>
    %66 = tpu.matmul %5, %65, %cst_33 {dimension_numbers = #tpu.dot_dimension_numbers<[1], [1], [0], [0], [0, 0, 1, 0], [], []>} : vector<1x32xf32>, vector<32x32xf32>, vector<1x32xf32> -> vector<1x32xf32>
    %cst_34 = arith.constant dense<0.000000e+00> : vector<8x32xf32>
    %67 = tpu.matmul %0, %65, %cst_34 {dimension_numbers = #tpu.dot_dimension_numbers<[1], [1], [0], [0], [0, 0, 1, 0], [], []>} : vector<8x32xf32>, vector<32x32xf32>, vector<8x32xf32> -> vector<8x32xf32>
    %68 = vector.broadcast %66 : vector<1x32xf32> to vector<8x32xf32>
    %69 = arith.subf %67, %68 : vector<8x32xf32>
    %c0_35 = arith.constant 0 : index
    %c0_36 = arith.constant 0 : index
    %70 = vector.load %arg2[%c0_35, %c0_36] : memref<8x32xf32, #tpu.memory_space<vmem>>, vector<8x32xf32>
    tpu.vector_store %arg2[%c0_35, %c0_36], %69 {strides = array<i32>} : memref<8x32xf32, #tpu.memory_space<vmem>>, vector<8x32xf32>,
    return
  }
  func.func @transform_0(%arg0: i32) -> (i32, i32) {
    %c0_i32 = arith.constant 0 : i32
    %c0_i32_0 = arith.constant 0 : i32
    %c0_i32_1 = arith.constant 0 : i32
    return %c0_i32, %c0_i32_0 : i32, i32
  }
  func.func @transform_1(%arg0: i32) -> (i32, i32) {
    %c0_i32 = arith.constant 0 : i32
    %c0_i32_0 = arith.constant 0 : i32
    %c0_i32_1 = arith.constant 0 : i32
    return %c0_i32, %c0_i32_0 : i32, i32
  }
}

</mosaic_0001>

<bundles_post_ra>
// kernel: whitening2d_iternorm.1
= control target key start
LH: loop header
LB: loop body
LE: loop exit
PB: predicated region body
PF: predicated region fallthrough
CT: control target
= control target key end

     0   :  { %6 = vsyncpa [#allocation3], 0  ;;  %s2474_s0 = inlined_call_operand.hbm [shape: f32[8,32], index: 0, kind: input, shape index: {}]   ;;  %s2475_s1 = inlined_call_operand.hbm [shape: f32[8,32], index: 1, kind: output, shape index: {}]  }
   0x1   :  { %7 = vsyncpa [#allocation4], 0  ;;  %s2321_s6 = smov [#allocation2]   ;;  %s2273_s10 = scalar_lea.hbm %s2474_s0, 128 }
   0x2   :  { %s14_s7 = sshll.u32 %s2321_s6, 4  ;;  %p2274_p0 = scmp.ne.s32.totalorder %s2474_s0, %s2273_s10  ;;  %s15_s7 = int_to_ptr.vmem [resolvable:$true] %s14_s7 }
   0x3   :  { %p2277_p1 = scmp.lt.u32.totalorder %s2273_s10, %s2474_s0 }
   0x5   :  { %p2279_p2 = pnand %p2277_p1, %p2274_p0 }
   0x7   :  { %2282 = shalt.err (!%p2279_p2)
}
   0x8   :  { %s2283_s15 = scalar_lea.vmem %s15_s7, 128  ;;  %p2288_p4 = scmp.lt.s32.totalorder %s15_s7, %s15_s7 }
   0x9   :  { %p2284_p3 = scmp.ne.s32.totalorder %s15_s7, %s2283_s15  ;;  %p2289_p5 = scmp.lt.s32.totalorder %s2283_s15, %s2283_s15 }
   0xb   :  { %p2290_p6 = por %p2289_p5, %p2288_p4 }
   0xd   :  { %p2291_p7 = pnand %p2290_p6, %p2284_p3 }
   0xf   :  { %2294 = shalt.err (!%p2291_p7)
}
  0x10   :  { %17 = dma.hbm_to_vmem [thread:$0]  %s2474_s0, 128, %s15_s7, [#allocation3]  }
  0x11   :  { %2317 = dma.done.wait [#allocation3], 128  }
  0x12   :  { %2318 = vsyncadd [#allocation3], 4294967168  ;;  %vm22_vm0 = vcmask 261120   ;;  %v2348_v0 = vld [vmem:[#allocation2] sm:$0xff]  ;;  %vm206_vm1 = vcmask 1040384   ;;  %vm193_vm2 = vcmask 7168   ;;  %v303_v19 = vlaneseq }
  0x13   :  { %v23_v1 = vsel %vm22_vm0, %v2348_v0, 0.0  ;;  %1940 = vmatprep.subr.mxu0 %v2348_v0  ;;  %vm62_vm3 = vcmask 64512   ;;  %v2322_v61 = vmov 0.0   ;;  %vm2324_vm8 = vmmov 0   ;;  %vm2244_vm9 = vmpackc.low %vm22_vm0, %vm22_vm0  ;;  %s2325_s21 = smov [#allocation5]  }
  0x14   :  { %v24_v2 = vrot.slane %v23_v1, 4  ;;  %1941 = vmatpush3.msra.mxu0 %v2348_v0  ;;  %v2360_v22 = vshrl.u32 %v303_v19, 7  ;;  %v309_v25 = vand.u32 127, %v303_v19  ;;  %s1748_s22 = sshll.u32 %s2325_s21, 4  ;;  %s1749_s22 = int_to_ptr.vmem [resolvable:$true] %s1748_s22 }
  0x15   :  { %s2295_s23 = scalar_lea.vmem %s1749_s22, 128  ;;  %p2300_p9 = scmp.lt.s32.totalorder %s1749_s22, %s1749_s22 }
  0x16   :  { %v25_v3 = vadd.f32 %v24_v2, %v23_v1  ;;  %v305_v24 = vadd.s32 8, %v2360_v22  ;;  %vm310_vm5 = vcmp.eq.s32.totalorder %v2360_v22, %v309_v25  ;;  %v307_v31 = vadd.s32 24, %v2360_v22  ;;  %p2296_p8 = scmp.ne.s32.totalorder %s1749_s22, %s2295_s23  ;;  %p2301_p10 = scmp.lt.s32.totalorder %s2295_s23, %s2295_s23 }
  0x17   :  { %v306_v32 = vadd.s32 16, %v2360_v22  ;;  %v314_v63 = vsel %vm310_vm5, 1.0, %v2322_v61 }
  0x18   :  { %v26_v4 = vrot.slane %v25_v3, 2  ;;  %vm311_vm4 = vcmp.eq.s32.totalorder %v305_v24, %v309_v25  ;;  %vm313_vm6 = vcmp.eq.s32.totalorder %v307_v31, %v309_v25  ;;  %p2302_p11 = por %p2301_p10, %p2300_p9 }
  0x19   :  { %vm312_vm7 = vcmp.eq.s32.totalorder %v306_v32, %v309_v25  ;;  %v315_v62 = vsel %vm311_vm4, 1.0, %v2322_v61  ;;  %v317_v2 = vsel %vm313_vm6, 1.0, %v2322_v61 }
  0x1a   :  { %v27_v5 = vadd.f32 %v26_v4, %v25_v3  ;;  %v316_v1 = vsel %vm312_vm7, 1.0, %v2322_v61  ;;  %v348_v3 = vmul.f32 1.5, %v315_v62  ;;  %v347_v4 = vmul.f32 1.5, %v314_v63  ;;  %p2303_p12 = pnand %p2302_p11, %p2296_p8 }
  0x1c   :  { %v28_v6 = vrot.slane %v27_v5, 1 }
  0x1e   :  { %v29_v7 = vadd.f32 %v28_v6, %v27_v5  ;;  %v349_v5 = vmul.f32 1.5, %v316_v1  ;;  %v350_v6 = vmul.f32 1.5, %v317_v2 }
  0x20   :  { %v2354_v8 = vmul.f32 0.125, %v29_v7 }
  0x22   :  { %161 = vxpose.xlu0.b32.start.end [1/1] (short) (narrow) %v2354_v8, 32  ;;  %1948 = vmatprep.subr.msk.mxu1 %vm206_vm1, %v2354_v8 }
  0x23   :  { %1949 = vmatpush3.msk.msra.mxu1 %vm206_vm1, %v2354_v8 }
  0x2f   :  { %30 = vxpose.xlu0.b32.start.end [1/1] (short) (narrow) %v2348_v0, 32 }
  0xa2   :  { %v177_v9 = vpop.trf.xlu0 }
  0xa3   :  { %1950 = vmatprep.mubr.msk.f32.mxu1 %vm193_vm2, %v177_v9 }
  0xa6   :  { %v178_v10 = vpop.trf.xlu0 }
  0xa7   :  { %1951 = vmatmul.mubr.msk.f32.vlgmr.msra.gmra.mrb[0].mxu1 %vm193_vm2, %v178_v10 }
  0xaa   :  { %v179_v11 = vpop.trf.xlu0 }
  0xab   :  { %1953 = vmatprep.mubr.msk.f32.mxu1 %vm193_vm2, %v179_v11 }
  0xae   :  { %v180_v12 = vpop.trf.xlu0 }
  0xaf   :  { %1954 = vmatmul.mubr.msk.f32.gmra.mrb[2].mxu1 %vm193_vm2, %v180_v12 }
  0xb2   :  { %v46_v13 = vpop.trf.xlu0 }
  0xb3   :  { %1942 = vmatprep.mubr.msk.f32.mxu0 %vm62_vm3, %v46_v13 }
  0xb6   :  { %v47_v14 = vpop.trf.xlu0 }
  0xb7   :  { %1943 = vmatmul.mubr.msk.f32.vlgmr.msra.gmra.mrb[0].mxu0 %vm62_vm3, %v47_v14 }
  0xba   :  { %v48_v15 = vpop.trf.xlu0 }
  0xbb   :  { %1945 = vmatprep.mubr.msk.f32.mxu0 %vm62_vm3, %v48_v15 }
  0xbe   :  { %v49_v16 = vpop.trf.xlu0 }
  0xbf   :  { %1946 = vmatmul.mubr.msk.f32.gmra.mrb[2].mxu0 %vm62_vm3, %v49_v16 }
 0x17a   :  { %v1952_v17 = vpop.f32.mrb[0].mxu1 }
 0x17b   :  { %v276_v18 = vpop.f32.mrb[1].mxu1  ;;  %v296_v23 = vmul.f32 8.0, %v1952_v17 }
 0x17c   :  { %v295_v26 = vmul.f32 8.0, %v276_v18 }
 0x182   :  { %v1955_v20 = vpop.f32.mrb[2].mxu1 }
 0x183   :  { %v286_v21 = vpop.f32.mrb[3].mxu1  ;;  %v298_v35 = vmul.f32 8.0, %v1955_v20 }
 0x184   :  { %v297_v36 = vmul.f32 8.0, %v286_v21 }
 0x18a   :  { %v1944_v27 = vpop.f32.mrb[0].mxu0 }
 0x18b   :  { %v300_v28 = vsub.f32 %v1944_v27, %v296_v23  ;;  %v141_v29 = vpop.f32.mrb[1].mxu0 }
 0x18c   :  { %v299_v30 = vsub.f32 %v141_v29, %v295_v26 }
 0x18d   :  { %v319_v33 = vsel %vm311_vm4, %v300_v28, 0.0 }
 0x18e   :  { %v318_v34 = vsel %vm310_vm5, %v299_v30, 0.0  ;;  %v323_v38 = vsel %vm22_vm0, %v319_v33, 0.0 }
 0x18f   :  { %v322_v39 = vsel %vm22_vm0, %v318_v34, 0.0 }
 0x190   :  { %v324_v45 = vadd.f32 %v323_v38, %v322_v39 }
 0x192   :  { %v1947_v37 = vpop.f32.mrb[2].mxu0 }
 0x193   :  { %v302_v40 = vsub.f32 %v1947_v37, %v298_v35  ;;  %v151_v41 = vpop.f32.mrb[3].mxu0 }
 0x194   :  { %v301_v42 = vsub.f32 %v151_v41, %v297_v36 }
 0x195   :  { %v321_v44 = vsel %vm313_vm6, %v302_v40, 0.0 }
 0x196   :  { %v320_v43 = vsel %vm312_vm7, %v301_v42, 0.0  ;;  %v327_v48 = vsel %vm22_vm0, %v321_v44, 0.0 }
 0x197   :  { %v325_v46 = vsel %vm22_vm0, %v320_v43, 0.0 }
 0x198   :  { %v326_v47 = vadd.f32 %v325_v46, %v324_v45 }
 0x19a   :  { %v328_v49 = vadd.f32 %v327_v48, %v326_v47 }
 0x19c   :  { %329 = vadd.xlane.f32.xlu1 %v328_v49 }
 0x229   :  { %v330_v50 = vpop.xlane.xlu1 %329 }
 0x22a   :  { %v331_v51 = vrot.slane %v330_v50, 4 }
 0x22c   :  { %v332_v52 = vadd.f32 %v331_v51, %v330_v50 }
 0x22e   :  { %v333_v53 = vrot.slane %v332_v52, 2 }
 0x230   :  { %v334_v54 = vadd.f32 %v333_v53, %v332_v52 }
 0x232   :  { %v335_v55 = vrot.slane %v334_v54, 1 }
 0x234   :  { %v336_v56 = vadd.f32 %v335_v55, %v334_v54 }
 0x236   :  { %2258 = vpush %v336_v56 }
 0x267   :  { %s2259_s0 = spop %2258 }
 0x268   :  { %v338_v57 = vstv %s2259_s0  ;;  %s346_s18 = smul.f32 0.14285715, %s2259_s0 }
 0x269   :  { %2269 = vrcp.f32 %v338_v57 }
 0x26a   :  { %v1571_v58 = vstv %s346_s18 }
 0x26b   :  { %2271 = vrsqrt.f32 %v1571_v58 }
 0x273   :  { %v2270_v59 = vpop.eup %2269 }
 0x274   :  { %2260 = vpush %v2270_v59 }
 0x275   :  { %v2272_v60 = vpop.eup %2271 }
 0x276   :  { %2262 = vpush %v2272_v60 }
 0x2a5   :  { %s2261_s19 = spop %2260 }
 0x2a6   :  { %v341_v7 = vstv %s2261_s19 }
 0x2a7   :  { %v342_v9 = vmul.f32 %v341_v7, %v299_v30  ;;  %v343_v10 = vmul.f32 %v341_v7, %v300_v28  ;;  %v344_v11 = vmul.f32 %v341_v7, %v301_v42  ;;  %v345_v12 = vmul.f32 %v341_v7, %v302_v40  ;;  %s2263_s20 = spop %2262 }
 0x2a9   :  { %v351_v13 = vmul.f32 0.5, %v342_v9  ;;  %v352_v14 = vmul.f32 0.5, %v343_v10  ;;  %v353_v15 = vmul.f32 0.5, %v344_v11  ;;  %v354_v16 = vmul.f32 0.5, %v345_v12 }
 0x2aa   :  { %v2385_v24 = vpack.c.bf16 %v343_v10, %v342_v9  ;;  %v2388_v25 = vpack.c.bf16 %v345_v12, %v344_v11 }
 0x2ab   :  { %v356_v17 = vsub.f32 %v348_v3, %v352_v14  ;;  %v357_v18 = vsub.f32 %v349_v5, %v353_v15  ;;  %v358_v19 = vsub.f32 %v350_v6, %v354_v16  ;;  %v355_v20 = vsub.f32 %v347_v4, %v351_v13 }
 0x2ad   :  { %1964 = vmatprep.mubr.msk.f32.mxu0 %vm22_vm0, %v355_v20  ;;  %v2146_v21 = vpack.c.bf16 %v356_v17, %v355_v20  ;;  %v2150_v23 = vpack.c.bf16 %v358_v19, %v357_v18  ;;  %v554_v35 = vmul.f32 1.5, %v356_v17  ;;  %v553_v38 = vmul.f32 1.5, %v355_v20 }
 0x2ae   :  { %v556_v43 = vmul.f32 1.5, %v358_v19  ;;  %v555_v47 = vmul.f32 1.5, %v357_v18 }
 0x2af   :  { %2147 = vmatprep.subr.bf16.mxu0 %v2146_v21  ;;  %2155 = vmatprep.subr.bf16.mxu1 %v2146_v21 }
 0x2b0   :  { %2149 = vmatpush3.bf16.msra.mxu0 %v2146_v21  ;;  %2157 = vmatpush3.bf16.msra.mxu1 %v2146_v21 }
 0x2b1   :  { %2151 = vmatprep.subr.bf16.mxu0 %v2150_v23  ;;  %2159 = vmatprep.subr.bf16.mxu1 %v2150_v23 }
 0x2b4   :  { %2153 = vmatpush3.bf16.msra.mxu0 %v2150_v23  ;;  %2161 = vmatpush3.bf16.msra.mxu1 %v2150_v23 }
 0x2b5   :  { %2163 = vmatprep.subr.bf16.mxu0 %v2385_v24 }
 0x2b7   :  { %1965 = vmatmul.mubr.msk.f32.vlgmr.msra.gmra.mrb[4].mxu0 %vm22_vm0, %v356_v17 }
 0x2b8   :  { %1967 = vmatprep.mubr.msk.f32.mxu0 %vm22_vm0, %v357_v18  ;;  %2165 = vmatpush3.bf16.msra.mxu0 %v2385_v24 }
 0x2b9   :  { %2167 = vmatprep.subr.bf16.mxu0 %v2388_v25 }
 0x2bb   :  { %1968 = vmatmul.mubr.msk.f32.gmra.mrb[6].mxu0 %vm22_vm0, %v358_v19 }
 0x2bc   :  { %2169 = vmatpush3.bf16.msra.mxu0 %v2388_v25 }
 0x38a   :  { %v1966_v26 = vpop.f32.mrb[4].mxu0 }
 0x38b   :  { %v437_v27 = vpop.f32.mrb[5].mxu0 }
 0x38c   :  { %1978 = vmatprep.mubr.msk.f32.mxu1 %vm22_vm0, %v437_v27 }
 0x38d   :  { %1979 = vmatmul.mubr.msk.f32.vlgmr.msra.gmra.mrb[4].mxu1 %vm22_vm0, %v1966_v26 }
 0x38e   :  { %v1969_v28 = vpop.f32.mrb[6].mxu0 }
 0x38f   :  { %v447_v29 = vpop.f32.mrb[7].mxu0 }
 0x390   :  { %1981 = vmatprep.mubr.msk.f32.mxu1 %vm22_vm0, %v447_v29 }
 0x391   :  { %1982 = vmatmul.mubr.msk.f32.gmra.mrb[6].mxu1 %vm22_vm0, %v1969_v28 }
 0x460   :  { %v1980_v30 = vpop.f32.mrb[4].mxu1 }
 0x461   :  { %v534_v31 = vpop.f32.mrb[5].mxu1 }
 0x462   :  { %1992 = vmatprep.mubr.msk.f32.mxu0 %vm22_vm0, %v534_v31 }
 0x463   :  { %1993 = vmatmul.mubr.msk.f32.vlgmr.msra.gmra.mrb[8].mxu0 %vm22_vm0, %v1980_v30 }
 0x464   :  { %v1983_v32 = vpop.f32.mrb[6].mxu1 }
 0x465   :  { %v544_v33 = vpop.f32.mrb[7].mxu1 }
 0x466   :  { %1995 = vmatprep.mubr.msk.f32.mxu0 %vm22_vm0, %v544_v33 }
 0x467   :  { %1996 = vmatmul.mubr.msk.f32.gmra.mrb[10].mxu0 %vm22_vm0, %v1983_v32 }
 0x536   :  { %v1994_v34 = vpop.f32.mrb[8].mxu0 }
 0x537   :  { %v655_v36 = vmul.f32 0.5, %v1994_v34  ;;  %v635_v37 = vpop.f32.mrb[9].mxu0 }
 0x538   :  { %v654_v39 = vmul.f32 0.5, %v635_v37 }
 0x539   :  { %v659_v40 = vsub.f32 %v554_v35, %v655_v36 }
 0x53a   :  { %v658_v41 = vsub.f32 %v553_v38, %v654_v39  ;;  %v1997_v42 = vpop.f32.mrb[10].mxu0 }
 0x53b   :  { %v657_v44 = vmul.f32 0.5, %v1997_v42  ;;  %v645_v45 = vpop.f32.mrb[11].mxu0  ;;  %v857_v62 = vmul.f32 1.5, %v659_v40 }
 0x53c   :  { %v2170_v46 = vpack.c.bf16 %v659_v40, %v658_v41  ;;  %v656_v48 = vmul.f32 0.5, %v645_v45  ;;  %2006 = vmatprep.mubr.msk.f32.mxu1 %vm22_vm0, %v658_v41  ;;  %v856_v2 = vmul.f32 1.5, %v658_v41 }
 0x53d   :  { %v661_v49 = vsub.f32 %v556_v43, %v657_v44 }
 0x53e   :  { %v660_v50 = vsub.f32 %v555_v47, %v656_v48  ;;  %2171 = vmatprep.subr.bf16.mxu1 %v2170_v46  ;;  %2179 = vmatprep.subr.bf16.mxu0 %v2170_v46 }
 0x53f   :  { %2173 = vmatpush3.bf16.msra.mxu1 %v2170_v46  ;;  %2181 = vmatpush3.bf16.msra.mxu0 %v2170_v46  ;;  %v859_v7 = vmul.f32 1.5, %v661_v49 }
 0x540   :  { %v2174_v51 = vpack.c.bf16 %v661_v49, %v660_v50  ;;  %v858_v12 = vmul.f32 1.5, %v660_v50 }
 0x542   :  { %2175 = vmatprep.subr.bf16.mxu1 %v2174_v51  ;;  %2183 = vmatprep.subr.bf16.mxu0 %v2174_v51 }
 0x543   :  { %2177 = vmatpush3.bf16.msra.mxu1 %v2174_v51  ;;  %2185 = vmatpush3.bf16.msra.mxu0 %v2174_v51 }
 0x544   :  { %2187 = vmatprep.subr.bf16.mxu1 %v2385_v24 }
 0x546   :  { %2007 = vmatmul.mubr.msk.f32.vlgmr.msra.gmra.mrb[8].mxu1 %vm22_vm0, %v659_v40 }
 0x547   :  { %2009 = vmatprep.mubr.msk.f32.mxu1 %vm22_vm0, %v660_v50  ;;  %2189 = vmatpush3.bf16.msra.mxu1 %v2385_v24 }
 0x548   :  { %2191 = vmatprep.subr.bf16.mxu1 %v2388_v25 }
 0x54a   :  { %2010 = vmatmul.mubr.msk.f32.gmra.mrb[10].mxu1 %vm22_vm0, %v661_v49 }
 0x54b   :  { %2193 = vmatpush3.bf16.msra.mxu1 %v2388_v25 }
 0x619   :  { %v2008_v52 = vpop.f32.mrb[8].mxu1 }
 0x61a   :  { %v740_v53 = vpop.f32.mrb[9].mxu1 }
 0x61b   :  { %2020 = vmatprep.mubr.msk.f32.mxu0 %vm22_vm0, %v740_v53 }
 0x61c   :  { %2021 = vmatmul.mubr.msk.f32.vlgmr.msra.gmra.mrb[12].mxu0 %vm22_vm0, %v2008_v52  ;;  %v2323_v52 = vmov 0.0|0.0  }
 0x61d   :  { %v2011_v54 = vpop.f32.mrb[10].mxu1 }
 0x61e   :  { %v750_v55 = vpop.f32.mrb[11].mxu1 }
 0x61f   :  { %2023 = vmatprep.mubr.msk.f32.mxu0 %vm22_vm0, %v750_v55 }
 0x620   :  { %2024 = vmatmul.mubr.msk.f32.gmra.mrb[14].mxu0 %vm22_vm0, %v2011_v54 }
 0x6ef   :  { %v2022_v56 = vpop.f32.mrb[12].mxu0 }
 0x6f0   :  { %v837_v57 = vpop.f32.mrb[13].mxu0 }
 0x6f1   :  { %2034 = vmatprep.mubr.msk.f32.mxu1 %vm22_vm0, %v837_v57 }
 0x6f2   :  { %2035 = vmatmul.mubr.msk.f32.vlgmr.msra.gmra.mrb[12].mxu1 %vm22_vm0, %v2022_v56 }
 0x6f3   :  { %v2025_v58 = vpop.f32.mrb[14].mxu0 }
 0x6f4   :  { %v847_v59 = vpop.f32.mrb[15].mxu0 }
 0x6f5   :  { %2037 = vmatprep.mubr.msk.f32.mxu1 %vm22_vm0, %v847_v59 }
 0x6f6   :  { %2038 = vmatmul.mubr.msk.f32.gmra.mrb[14].mxu1 %vm22_vm0, %v2025_v58 }
 0x7c5   :  { %v2036_v60 = vpop.f32.mrb[12].mxu1 }
 0x7c6   :  { %v958_v63 = vmul.f32 0.5, %v2036_v60  ;;  %v938_v1 = vpop.f32.mrb[13].mxu1  ;;  %v1574_v60 = vstv %s2263_s20 }
 0x7c7   :  { %v957_v3 = vmul.f32 0.5, %v938_v1 }
 0x7c8   :  { %v962_v4 = vsub.f32 %v857_v62, %v958_v63 }
 0x7c9   :  { %v961_v5 = vsub.f32 %v856_v2, %v957_v3  ;;  %v2039_v6 = vpop.f32.mrb[14].mxu1 }
 0x7ca   :  { %v960_v9 = vmul.f32 0.5, %v2039_v6  ;;  %v948_v10 = vpop.f32.mrb[15].mxu1  ;;  %v1160_v29 = vmul.f32 1.5, %v962_v4 }
 0x7cb   :  { %v2194_v11 = vpack.c.bf16 %v962_v4, %v961_v5  ;;  %v959_v13 = vmul.f32 0.5, %v948_v10  ;;  %2048 = vmatprep.mubr.msk.f32.mxu0 %vm22_vm0, %v961_v5  ;;  %v1159_v32 = vmul.f32 1.5, %v961_v5 }
 0x7cc   :  { %v964_v14 = vsub.f32 %v859_v7, %v960_v9 }
 0x7cd   :  { %v963_v15 = vsub.f32 %v858_v12, %v959_v13  ;;  %2195 = vmatprep.subr.bf16.mxu0 %v2194_v11  ;;  %2203 = vmatprep.subr.bf16.mxu1 %v2194_v11 }
 0x7ce   :  { %2197 = vmatpush3.bf16.msra.mxu0 %v2194_v11  ;;  %2205 = vmatpush3.bf16.msra.mxu1 %v2194_v11  ;;  %v1162_v37 = vmul.f32 1.5, %v964_v14 }
 0x7cf   :  { %v2198_v16 = vpack.c.bf16 %v964_v14, %v963_v15  ;;  %v1161_v41 = vmul.f32 1.5, %v963_v15 }
 0x7d1   :  { %2199 = vmatprep.subr.bf16.mxu0 %v2198_v16  ;;  %2207 = vmatprep.subr.bf16.mxu1 %v2198_v16 }
 0x7d2   :  { %2201 = vmatpush3.bf16.msra.mxu0 %v2198_v16  ;;  %2209 = vmatpush3.bf16.msra.mxu1 %v2198_v16 }
 0x7d3   :  { %2211 = vmatprep.subr.bf16.mxu0 %v2385_v24 }
 0x7d5   :  { %2049 = vmatmul.mubr.msk.f32.vlgmr.msra.gmra.mrb[16].mxu0 %vm22_vm0, %v962_v4 }
 0x7d6   :  { %2051 = vmatprep.mubr.msk.f32.mxu0 %vm22_vm0, %v963_v15  ;;  %2213 = vmatpush3.bf16.msra.mxu0 %v2385_v24 }
 0x7d7   :  { %2215 = vmatprep.subr.bf16.mxu0 %v2388_v25 }
 0x7d9   :  { %2052 = vmatmul.mubr.msk.f32.gmra.mrb[18].mxu0 %vm22_vm0, %v964_v14  ;;  %v1738_v14 = vsub.s32 0, %v2360_v22 }
 0x7da   :  { %2217 = vmatpush3.bf16.msra.mxu0 %v2388_v25 }
 0x8a8   :  { %v2050_v17 = vpop.f32.mrb[16].mxu0 }
 0x8a9   :  { %v1043_v18 = vpop.f32.mrb[17].mxu0 }
 0x8aa   :  { %2062 = vmatprep.mubr.msk.f32.mxu1 %vm22_vm0, %v1043_v18 }
 0x8ab   :  { %2063 = vmatmul.mubr.msk.f32.vlgmr.msra.gmra.mrb[16].mxu1 %vm22_vm0, %v2050_v17 }
 0x8ac   :  { %v2053_v19 = vpop.f32.mrb[18].mxu0 }
 0x8ad   :  { %v1053_v20 = vpop.f32.mrb[19].mxu0 }
 0x8ae   :  { %2065 = vmatprep.mubr.msk.f32.mxu1 %vm22_vm0, %v1053_v20 }
 0x8af   :  { %2066 = vmatmul.mubr.msk.f32.gmra.mrb[18].mxu1 %vm22_vm0, %v2053_v19 }
 0x97e   :  { %v2064_v21 = vpop.f32.mrb[16].mxu1 }
 0x97f   :  { %v1140_v23 = vpop.f32.mrb[17].mxu1 }
 0x980   :  { %2076 = vmatprep.mubr.msk.f32.mxu0 %vm22_vm0, %v1140_v23 }
 0x981   :  { %2077 = vmatmul.mubr.msk.f32.vlgmr.msra.gmra.mrb[20].mxu0 %vm22_vm0, %v2064_v21 }
 0x982   :  { %v2067_v26 = vpop.f32.mrb[18].mxu1 }
 0x983   :  { %v1150_v27 = vpop.f32.mrb[19].mxu1 }
 0x984   :  { %2079 = vmatprep.mubr.msk.f32.mxu0 %vm22_vm0, %v1150_v27 }
 0x985   :  { %2080 = vmatmul.mubr.msk.f32.gmra.mrb[22].mxu0 %vm22_vm0, %v2067_v26 }
 0xa54   :  { %v2078_v28 = vpop.f32.mrb[20].mxu0 }
 0xa55   :  { %v1261_v30 = vmul.f32 0.5, %v2078_v28  ;;  %v1241_v31 = vpop.f32.mrb[21].mxu0 }
 0xa56   :  { %v1260_v33 = vmul.f32 0.5, %v1241_v31 }
 0xa57   :  { %v1265_v34 = vsub.f32 %v1160_v29, %v1261_v30 }
 0xa58   :  { %v1264_v35 = vsub.f32 %v1159_v32, %v1260_v33  ;;  %v2081_v36 = vpop.f32.mrb[22].mxu0 }
 0xa59   :  { %v1263_v38 = vmul.f32 0.5, %v2081_v36  ;;  %v1251_v39 = vpop.f32.mrb[23].mxu0  ;;  %v1463_v54 = vmul.f32 1.5, %v1265_v34 }
 0xa5a   :  { %v2218_v40 = vpack.c.bf16 %v1265_v34, %v1264_v35  ;;  %v1262_v42 = vmul.f32 0.5, %v1251_v39  ;;  %2090 = vmatprep.mubr.msk.f32.mxu1 %vm22_vm0, %v1264_v35  ;;  %v1462_v57 = vmul.f32 1.5, %v1264_v35 }
 0xa5b   :  { %v1267_v43 = vsub.f32 %v1162_v37, %v1263_v38 }
 0xa5c   :  { %v1266_v44 = vsub.f32 %v1161_v41, %v1262_v42  ;;  %2219 = vmatprep.subr.bf16.mxu1 %v2218_v40  ;;  %2227 = vmatprep.subr.bf16.mxu0 %v2218_v40 }
 0xa5d   :  { %2221 = vmatpush3.bf16.msra.mxu1 %v2218_v40  ;;  %2229 = vmatpush3.bf16.msra.mxu0 %v2218_v40  ;;  %v1465_v2 = vmul.f32 1.5, %v1267_v43 }
 0xa5e   :  { %v2222_v45 = vpack.c.bf16 %v1267_v43, %v1266_v44  ;;  %v1464_v6 = vmul.f32 1.5, %v1266_v44 }
 0xa60   :  { %2223 = vmatprep.subr.bf16.mxu1 %v2222_v45  ;;  %2231 = vmatprep.subr.bf16.mxu0 %v2222_v45 }
 0xa61   :  { %2225 = vmatpush3.bf16.msra.mxu1 %v2222_v45  ;;  %2233 = vmatpush3.bf16.msra.mxu0 %v2222_v45 }
 0xa62   :  { %2235 = vmatprep.subr.bf16.mxu1 %v2385_v24  ;;  %2242 = vmatprep.subr.bf16.mxu0 %v2323_v52 }
 0xa64   :  { %2091 = vmatmul.mubr.msk.f32.vlgmr.msra.gmra.mrb[20].mxu1 %vm22_vm0, %v1265_v34 }
 0xa65   :  { %2093 = vmatprep.mubr.msk.f32.mxu1 %vm22_vm0, %v1266_v44  ;;  %2237 = vmatpush3.bf16.msra.mxu1 %v2385_v24 }
 0xa66   :  { %2239 = vmatprep.subr.bf16.mxu1 %v2388_v25 }
 0xa68   :  { %2094 = vmatmul.mubr.msk.f32.gmra.mrb[22].mxu1 %vm22_vm0, %v1267_v43 }
 0xa69   :  { %2241 = vmatpush3.bf16.msra.mxu1 %v2388_v25 }
 0xa6a   :  { %2250 = vmatprep.subr.bf16.mxu1 %v2323_v52 }
 0xb37   :  { %v2092_v46 = vpop.f32.mrb[20].mxu1 }
 0xb38   :  { %v1346_v47 = vpop.f32.mrb[21].mxu1 }
 0xb39   :  { %2104 = vmatprep.mubr.msk.f32.mxu0 %vm22_vm0, %v1346_v47 }
 0xb3a   :  { %2105 = vmatmul.mubr.msk.f32.vlgmr.msra.gmra.mrb[24].mxu0 %vm22_vm0, %v2092_v46 }
 0xb3b   :  { %v2095_v48 = vpop.f32.mrb[22].mxu1 }
 0xb3c   :  { %v1356_v49 = vpop.f32.mrb[23].mxu1 }
 0xb3d   :  { %2107 = vmatprep.mubr.msk.f32.mxu0 %vm22_vm0, %v1356_v49 }
 0xb3e   :  { %2108 = vmatmul.mubr.msk.f32.gmra.mrb[26].mxu0 %vm22_vm0, %v2095_v48 }
 0xb3f   :  { %2132 = vmatprep.mubr.msk.f32.mxu0 %vm2324_vm8, %v2322_v61 }
 0xc0d   :  { %v2106_v50 = vpop.f32.mrb[24].mxu0 }
 0xc0e   :  { %v1443_v24 = vpop.f32.mrb[25].mxu0 }
 0xc0f   :  { %2118 = vmatprep.mubr.msk.f32.mxu1 %vm22_vm0, %v1443_v24 }
 0xc10   :  { %2119 = vmatmul.mubr.msk.f32.vlgmr.msra.gmra.mrb[24].mxu1 %vm22_vm0, %v2106_v50 }
 0xc11   :  { %v2109_v51 = vpop.f32.mrb[26].mxu0 }
 0xc12   :  { %v1453_v25 = vpop.f32.mrb[27].mxu0 }
 0xc13   :  { %2121 = vmatprep.mubr.msk.f32.mxu1 %vm22_vm0, %v1453_v25 }
 0xc14   :  { %2122 = vmatmul.mubr.msk.f32.gmra.mrb[26].mxu1 %vm22_vm0, %v2109_v51 }
 0xc15   :  { %2143 = vmatprep.mubr.msk.f32.mxu1 %vm2324_vm8, %v2322_v61 }
 0xce3   :  { %v2120_v53 = vpop.f32.mrb[24].mxu1 }
 0xce4   :  { %v1564_v55 = vmul.f32 0.5, %v2120_v53  ;;  %v1544_v56 = vpop.f32.mrb[25].mxu1 }
 0xce5   :  { %v1563_v58 = vmul.f32 0.5, %v1544_v56 }
 0xce6   :  { %v1568_v59 = vsub.f32 %v1463_v54, %v1564_v55 }
 0xce7   :  { %v1567_v62 = vsub.f32 %v1462_v57, %v1563_v58  ;;  %v2123_v63 = vpop.f32.mrb[26].mxu1 }
 0xce8   :  { %v1576_v1 = vmul.f32 %v1574_v60, %v1568_v59  ;;  %v1566_v3 = vmul.f32 0.5, %v2123_v63  ;;  %v1554_v4 = vpop.f32.mrb[27].mxu1 }
 0xce9   :  { %v1575_v5 = vmul.f32 %v1574_v60, %v1567_v62  ;;  %v1565_v7 = vmul.f32 0.5, %v1554_v4 }
 0xcea   :  { %v1570_v9 = vsub.f32 %v1465_v2, %v1566_v3 }
 0xceb   :  { %v2243_v61 = vpack.c.bf16 %v1576_v1, %v1575_v5  ;;  %v1569_v10 = vsub.f32 %v1464_v6, %v1565_v7 }
 0xcec   :  { %v1578_v11 = vmul.f32 %v1574_v60, %v1570_v9 }
 0xced   :  { %v1577_v12 = vmul.f32 %v1574_v60, %v1569_v10  ;;  %2245 = vmatpush3.bf16.xpose.msk.msra.mxu0 %vm2244_vm9, %v2243_v61  ;;  %2253 = vmatpush3.bf16.xpose.msk.msra.mxu1 %vm2244_vm9, %v2243_v61 }
 0xcee   :  { %2246 = vmatprep.subr.bf16.mxu0 %v2323_v52  ;;  %2254 = vmatprep.subr.bf16.mxu1 %v2323_v52 }
 0xcef   :  { %v2247_v13 = vpack.c.bf16 %v1578_v11, %v1577_v12 }
 0xcf5   :  { %2249 = vmatpush3.bf16.xpose.msk.msra.mxu0 %vm2244_vm9, %v2247_v13  ;;  %2257 = vmatpush3.bf16.xpose.msk.msra.mxu1 %vm2244_vm9, %v2247_v13 }
 0xcfc   :  { %2133 = vmatmul.mubr.msk.f32.vlgmr.msra.gmra.mrb[28].mxu0 %vm22_vm0, %v2354_v8  ;;  %2144 = vmatmul.mubr.msk.f32.vlgmr.msra.gmra.mrb[28].mxu1 %vm22_vm0, %v2348_v0 }
 0xdcf   :  { %v1659_v15 = vpop.f32.mrb[28].mxu0  ;;  %v1732_v16 = vpop.f32.mrb[28].mxu1 }
 0xdd0   :  { %v1739_v17 = vrot.slane %v1659_v15, %v1738_v14  ;;  %v2134_v18 = vpop.f32.mrb[29].mxu0  ;;  %v2145_v19 = vpop.f32.mrb[29].mxu1 }
 0xdd2   :  { %v1740_v20 = vsub.f32 %v1732_v16, %v1739_v17 }
 0xdd4   :  { %1741 = vst.msk [vmem:[#allocation5] sm:$0xff] %vm22_vm0, %v1740_v20 }
 0xdd5   :  { %2306 = shalt.err (!%p2303_p12)
}
 0xdd6   :  { %s2307_s26 = scalar_lea.hbm %s2475_s1, 128 }
 0xdd7   :  { %p2308_p13 = scmp.ne.s32.totalorder %s2475_s1, %s2307_s26  ;;  %p2311_p0 = scmp.lt.u32.totalorder %s2307_s26, %s2475_s1 }
 0xdd9   :  { %p2313_p1 = pnand %p2311_p0, %p2308_p13 }
 0xddb   :  { %2316 = shalt.err (!%p2313_p1)
}
 0xddc   :  { %1751 = dma.vmem_to_hbm [thread:$0]  %s1749_s22, 128, %s2475_s1, [#allocation4]  }
 0xddd   :  { %2319 = dma.done.wait [#allocation4], 128  }
 0xdde   :  { %2320 = vsyncadd [#allocation4], 4294967168 }
 0xddf   :  { %1755 = vsyncpa [#allocation3], 1 }
 0xde0   :  { %1756 = vsyncpa [#allocation4], 1 }

</bundles_post_ra>
